<compile_context>
chip_gen: v7x
topology: tpu7x:2x2x1
jax: 0.10.0
libtpu: 0.0.40
codegen_flags: <defaults>
</compile_context>

<pallas_src>
import math

import jax
import jax.numpy as jnp
import numpy as np
from jax.experimental import pallas as pl
from jax.experimental.pallas import tpu as pltpu

# ---- model / problem sizes (small, consistent with the module's forward) ----
B, S, H = 2, 8, 32          # batch, sequence, hidden_size
NUM_HEADS = 4
HEAD_DIM = H // NUM_HEADS
INTERMED = 64               # intermed_size (GELU nonlin, no GLU halving)
EPS = 1e-12                 # norm_eps
NHS = NUM_HEADS * S         # 32

# ---- weight blob layout: (W_ROWS, 128), all row offsets multiples of 8 ----
R_QKV = 0                   # (H, 3H)   fused QKV weight, lanes 0:96
R_WO = H                    # (H, H)    attention output projection
R_WIN = 2 * H               # (H, I)    FFN dense_in
R_WOUT = 3 * H              # (I, H)    FFN dense_out
R_BDM = 3 * H + INTERMED    # (NHS, H)  block-diagonal head mask
R_BDMT = R_BDM + NHS        # (H, NHS)  its transpose
W_ROWS = R_BDMT + H         # 224
W_LANES = 128

# ---- bias blob layout: (16, 128) ----
RB_LN1G, RB_LN1B, RB_LN2G, RB_LN2B = 0, 1, 2, 3
RB_BQ, RB_BK, RB_BV, RB_BO = 4, 5, 6, 7
RB_B1, RB_B2 = 8, 9
RB_MASK = 10                # rows 10:10+B   (requires B <= 6)
B_ROWS = 16


def _layernorm(x, g, b, eps):
    mu = jnp.mean(x, axis=-1, keepdims=True)
    var = jnp.mean((x - mu) ** 2, axis=-1, keepdims=True)
    return (x - mu) * jax.lax.rsqrt(var + eps) * g + b


def transformer_layer_kernel(x_ref, wb_ref, bb_ref, out_ref):
    x = x_ref[...]              # (B*S, H)
    wb = wb_ref[...]            # (W_ROWS, 128) packed weights + block-diag masks
    bb = bb_ref[...]            # (16, 128)     packed LN params, biases, attn mask

    # ---- unpack (every slice starts at lane 0; rows are 8-aligned) ----
    wqkv = wb[R_QKV:R_QKV + H, 0:3 * H]
    wo = wb[R_WO:R_WO + H, 0:H]
    win = wb[R_WIN:R_WIN + H, 0:INTERMED]
    wout = wb[R_WOUT:R_WOUT + INTERMED, 0:H]
    bd_mask = wb[R_BDM:R_BDM + NHS, 0:H]       # (NHS, H)
    bd_maskT = wb[R_BDMT:R_BDMT + H, 0:NHS]    # (H, NHS)

    ln1g = bb[RB_LN1G:RB_LN1G + 1, 0:H]
    ln1b = bb[RB_LN1B:RB_LN1B + 1, 0:H]
    ln2g = bb[RB_LN2G:RB_LN2G + 1, 0:H]
    ln2b = bb[RB_LN2B:RB_LN2B + 1, 0:H]
    bq = bb[RB_BQ:RB_BQ + 1, 0:H]
    bk = bb[RB_BK:RB_BK + 1, 0:H]
    bv = bb[RB_BV:RB_BV + 1, 0:H]
    bo = bb[RB_BO:RB_BO + 1, 0:H]
    b1 = bb[RB_B1:RB_B1 + 1, 0:INTERMED]
    b2 = bb[RB_B2:RB_B2 + 1, 0:H]
    maskt = bb[RB_MASK:RB_MASK + B, 0:NHS]     # (B, NHS) per-head tiled mask

    # ---- attention: LN1 -> fused QKV -> block-diag SDPA -> output proj ----
    xn = _layernorm(x, ln1g, ln1b, EPS)
    qkv = jnp.dot(xn, wqkv, preferred_element_type=jnp.float32)    # (B*S, 3H)
    # k/v lane slices start at 32/64 of a 96-lane slab: ~2 vregs of XLU rotate,
    # deliberately preferred over 3x-wider (zero-padded) weight-blob DMA.
    q = (qkv[:, 0:H] + bq).reshape(B, S, H)
    k = (qkv[:, H:2 * H] + bk).reshape(B, S, H)
    v = (qkv[:, 2 * H:3 * H] + bv).reshape(B, S, H)

    # K^T first (NUM_HEADS x less transpose work), then tile along lanes + mask.
    kT = jnp.transpose(k, (0, 2, 1))                               # (B, H, S)
    kT_bd = jnp.concatenate([kT] * NUM_HEADS, axis=2) * bd_maskT[None]  # (B,H,NHS)
    v_bd = jnp.concatenate([v] * NUM_HEADS, axis=1) * bd_mask[None]     # (B,NHS,H)

    scale = 1.0 / math.sqrt(HEAD_DIM)
    scores = jnp.einsum('bqc,bck->bqk', q, kT_bd,
                        preferred_element_type=jnp.float32) * scale
    scores = scores + maskt[:, None, :]                            # (B, S, NHS)

    # per-head running max (robust: no cross-head coupling -> no 0/0 underflow
    # even when one head is fully masked at -1e4 while another has large scores)
    m_parts = []
    for h in range(NUM_HEADS):
        mh = jnp.max(scores[:, :, h * S:(h + 1) * S], axis=-1, keepdims=True)
        m_parts.append(jnp.broadcast_to(mh, (B, S, S)))
    m_exp = jnp.concatenate(m_parts, axis=-1)                      # (B, S, NHS)

    e = jnp.exp(scores - m_exp)
    ctx = jnp.einsum('bqk,bkc->bqc', e, v_bd,
                     preferred_element_type=jnp.float32).reshape(B * S, H)
    denom = jnp.dot(e.reshape(B * S, NHS), bd_mask,
                    preferred_element_type=jnp.float32)            # per-head sums >= 1
    ctx = ctx * pl.reciprocal(denom, approx=True)                  # EUP slot

    attn_out = jnp.dot(ctx, wo, preferred_element_type=jnp.float32) + bo
    states = attn_out + attn_out    # attn + dropout(attn); dropout == identity (eval)

    # ---- FFN: LN2 -> dense_in -> GELU -> dense_out, residual ----
    sn = _layernorm(states, ln2g, ln2b, EPS)
    h1 = jnp.dot(sn, win, preferred_element_type=jnp.float32) + b1
    # tanh-approx GELU: one EUP tanh instead of erf's VPU polynomial (<~1e-3
    # elementwise deviation from exact GELU).
    # TODO(synk): revert to jax.lax.erf-based exact GELU if bit-faithful
    # numerics vs torch.nn.GELU() are required.
    c0 = math.sqrt(2.0 / math.pi)
    g1 = 0.5 * h1 * (1.0 + jnp.tanh(c0 * (h1 + 0.044715 * h1 * h1 * h1)))
    ffn_out = states + jnp.dot(g1, wout, preferred_element_type=jnp.float32) + b2

    # single lane-dense packed store: [ out | flattened scores ]
    out_ref[...] = jnp.concatenate([ffn_out, scores.reshape(B * S, NHS)], axis=-1)


def _pack_params(params):
    (ln1g, ln1b, ln2g, ln2b, wq, bq, wk, bk, wv, bv, wo, bo, w1, b1, w2, b2) = params

    # block-diagonal head mask (compile-time constant): rows = (head, key pos),
    # cols = hidden dim; 1 where the row's head owns that hidden column.
    rh = np.arange(NHS)[:, None] // S
    ch = np.arange(H)[None, :] // HEAD_DIM
    bd = (rh == ch).astype(np.float32)                  # (NHS, H)

    w_blob = jnp.zeros((W_ROWS, W_LANES), jnp.float32)
    w_blob = w_blob.at[R_QKV:R_QKV + H, 0:3 * H].set(
        jnp.concatenate([wq, wk, wv], axis=1))
    w_blob = w_blob.at[R_WO:R_WO + H, 0:H].set(wo)
    w_blob = w_blob.at[R_WIN:R_WIN + H, 0:INTERMED].set(w1)
    w_blob = w_blob.at[R_WOUT:R_WOUT + INTERMED, 0:H].set(w2)
    w_blob = w_blob.at[R_BDM:R_BDM + NHS, 0:H].set(jnp.asarray(bd))
    w_blob = w_blob.at[R_BDMT:R_BDMT + H, 0:NHS].set(jnp.asarray(bd.T))

    b_blob = jnp.zeros((B_ROWS, 128), jnp.float32)
    b_blob = b_blob.at[RB_LN1G, 0:H].set(ln1g.reshape(-1))
    b_blob = b_blob.at[RB_LN1B, 0:H].set(ln1b.reshape(-1))
    b_blob = b_blob.at[RB_LN2G, 0:H].set(ln2g.reshape(-1))
    b_blob = b_blob.at[RB_LN2B, 0:H].set(ln2b.reshape(-1))
    b_blob = b_blob.at[RB_BQ, 0:H].set(bq.reshape(-1))
    b_blob = b_blob.at[RB_BK, 0:H].set(bk.reshape(-1))
    b_blob = b_blob.at[RB_BV, 0:H].set(bv.reshape(-1))
    b_blob = b_blob.at[RB_BO, 0:H].set(bo.reshape(-1))
    b_blob = b_blob.at[RB_B1, 0:INTERMED].set(b1.reshape(-1))
    b_blob = b_blob.at[RB_B2, 0:H].set(b2.reshape(-1))
    return w_blob, b_blob


@jax.jit
def transformer_layer(x, attn_mask, params):
    """x: (B,S,H) f32; attn_mask: (B,1,S) additive f32; params: tuple of weights."""
    bsz, seq, hid = x.shape
    w_blob, b_blob = _pack_params(params)
    # per-head tiled mask packed into the bias blob -> 3 input DMAs total
    mask_t = jnp.tile(attn_mask.reshape(bsz, seq), (1, NUM_HEADS))      # (B, NH*S)
    b_blob = b_blob.at[RB_MASK:RB_MASK + bsz, 0:NUM_HEADS * seq].set(mask_t)
    x2 = x.reshape(bsz * seq, hid)

    slab = pl.pallas_call(
        transformer_layer_kernel,
        grid=(1,),
        in_specs=[
            pl.BlockSpec((bsz * seq, hid), lambda i: (0, 0)),           # x (flat)
            pl.BlockSpec((W_ROWS, W_LANES), lambda i: (0, 0)),          # weight blob
            pl.BlockSpec((B_ROWS, 128), lambda i: (0, 0)),              # bias blob
        ],
        out_specs=pl.BlockSpec((bsz * seq, hid + NUM_HEADS * seq), lambda i: (0, 0)),
        out_shape=jax.ShapeDtypeStruct((bsz * seq, hid + NUM_HEADS * seq),
                                       jnp.float32),
        compiler_params=pltpu.CompilerParams(dimension_semantics=("arbitrary",)),
    )(x2, w_blob, b_blob)

    out = slab[:, 0:hid].reshape(bsz, seq, hid)
    matmul_result = (slab[:, hid:hid + NUM_HEADS * seq]
                     .reshape(bsz, seq, NUM_HEADS, seq)
                     .transpose(0, 2, 1, 3)
                     .reshape(bsz * NUM_HEADS, seq, seq))
    return out, matmul_result


def reference(x, attn_mask, params):
    (ln1g, ln1b, ln2g, ln2b, wq, bq, wk, bk, wv, bv, wo, bo, w1, b1, w2, b2) = params

    def ln(v, g, b):
        mu = jnp.mean(v, axis=-1, keepdims=True)
        var = jnp.mean((v - mu) ** 2, axis=-1, keepdims=True)
        return (v - mu) / jnp.sqrt(var + EPS) * g + b

    xn = ln(x, ln1g[0], ln1b[0])
    q = xn @ wq + bq[0]
    k = xn @ wk + bk[0]
    v = xn @ wv + bv[0]
    qh = q.reshape(B, S, NUM_HEADS, HEAD_DIM).transpose(0, 2, 1, 3)
    kh = k.reshape(B, S, NUM_HEADS, HEAD_DIM).transpose(0, 2, 1, 3)
    vh = v.reshape(B, S, NUM_HEADS, HEAD_DIM).transpose(0, 2, 1, 3)
    sc = jnp.einsum('bhqd,bhkd->bhqk', qh, kh) / math.sqrt(HEAD_DIM)
    sc = sc + attn_mask[:, None, :, :]
    p = jax.nn.softmax(sc, axis=-1)
    ctx = jnp.einsum('bhqk,bhkd->bhqd', p, vh).transpose(0, 2, 1, 3).reshape(B, S, H)
    attn_out = ctx @ wo + bo[0]
    states = attn_out + attn_out
    sn = ln(states, ln2g[0], ln2b[0])
    h1 = sn @ w1 + b1[0]
    g1 = jax.nn.gelu(h1, approximate=False)
    out = states + (g1 @ w2 + b2[0])
    return out, sc.reshape(B * NUM_HEADS, S, S)


if __name__ == "__main__":
    key = jax.random.PRNGKey(0)
    keys = jax.random.split(key, 20)

    def w(k, shape, scale=0.05):
        return jax.random.normal(k, shape, jnp.float32) * scale

    params = (
        1.0 + 0.1 * jax.random.normal(keys[0], (1, H), jnp.float32),   # ln1 gamma
        0.1 * jax.random.normal(keys[1], (1, H), jnp.float32),         # ln1 beta
        1.0 + 0.1 * jax.random.normal(keys[2], (1, H), jnp.float32),   # ln2 gamma
        0.1 * jax.random.normal(keys[3], (1, H), jnp.float32),         # ln2 beta
        w(keys[4], (H, H)), w(keys[5], (1, H)),                        # Wq, bq
        w(keys[6], (H, H)), w(keys[7], (1, H)),                        # Wk, bk
        w(keys[8], (H, H)), w(keys[9], (1, H)),                        # Wv, bv
        w(keys[10], (H, H)), w(keys[11], (1, H)),                      # Wo, bo
        w(keys[12], (H, INTERMED)), w(keys[13], (1, INTERMED)),        # dense_in
        w(keys[14], (INTERMED, H)), w(keys[15], (1, H)),               # dense_out
    )

    x = jax.random.normal(keys[16], (B, S, H), jnp.float32)
    # BERT-style additive mask: mask out the last key position of batch 1
    attn_mask = jnp.zeros((B, 1, S), jnp.float32).at[1, 0, S - 1].set(-10000.0)

    out, matmul_result = transformer_layer(x, attn_mask, params)
    out = jax.block_until_ready(out)
    matmul_result = jax.block_until_ready(matmul_result)

    ref_out, ref_scores = reference(x, attn_mask, params)
    np.testing.assert_allclose(np.asarray(out), np.asarray(ref_out),
                               rtol=1e-2, atol=1e-2)
    np.testing.assert_allclose(np.asarray(matmul_result), np.asarray(ref_scores),
                               rtol=1e-2, atol=1e-2)

    print("KERNEL_OK")
</pallas_src>

<mosaic_0001>
module attributes {stable_mosaic.version = 11 : i64} {
  func.func @transformer_layer_kernel(%arg0: i32, %arg1: memref<16x32xf32, #tpu.memory_space<vmem>>, %arg2: memref<224x128xf32, #tpu.memory_space<vmem>>, %arg3: memref<16x128xf32, #tpu.memory_space<vmem>>, %arg4: memref<16x64xf32, #tpu.memory_space<vmem>>) attributes {dimension_semantics = [#tpu.dimension_semantics<arbitrary>], iteration_bounds = array<i64: 1>, scalar_prefetch = 0 : i64, scratch_operands = 0 : i64, tpu.core_type = #tpu.core_type<tc>, window_params = [{pipeline_mode = #tpu.pipeline_mode<synchronous>, transform_indices = @transform_0, window_bounds = array<i64: 16, 32>}, {pipeline_mode = #tpu.pipeline_mode<synchronous>, transform_indices = @transform_1, window_bounds = array<i64: 224, 128>}, {pipeline_mode = #tpu.pipeline_mode<synchronous>, transform_indices = @transform_2, window_bounds = array<i64: 16, 128>}, {pipeline_mode = #tpu.pipeline_mode<synchronous>, transform_indices = @transform_3, window_bounds = array<i64: 16, 64>}]} {
    %c0 = arith.constant 0 : index
    %c0_0 = arith.constant 0 : index
    %0 = vector.load %arg1[%c0, %c0_0] : memref<16x32xf32, #tpu.memory_space<vmem>>, vector<16x32xf32>
    %c0_1 = arith.constant 0 : index
    %c0_2 = arith.constant 0 : index
    %1 = vector.load %arg2[%c0_1, %c0_2] : memref<224x128xf32, #tpu.memory_space<vmem>>, vector<224x128xf32>
    %c0_3 = arith.constant 0 : index
    %c0_4 = arith.constant 0 : index
    %2 = vector.load %arg3[%c0_3, %c0_4] : memref<16x128xf32, #tpu.memory_space<vmem>>, vector<16x128xf32>
    %3 = vector.extract_strided_slice %1 {offsets = [0, 0], sizes = [32, 96], strides = [1, 1]} : vector<224x128xf32> to vector<32x96xf32>
    %4 = vector.extract_strided_slice %1 {offsets = [32, 0], sizes = [32, 32], strides = [1, 1]} : vector<224x128xf32> to vector<32x32xf32>
    %5 = vector.extract_strided_slice %1 {offsets = [64, 0], sizes = [32, 64], strides = [1, 1]} : vector<224x128xf32> to vector<32x64xf32>
    %6 = vector.extract_strided_slice %1 {offsets = [96, 0], sizes = [64, 32], strides = [1, 1]} : vector<224x128xf32> to vector<64x32xf32>
    %7 = vector.extract_strided_slice %1 {offsets = [160, 0], sizes = [32, 32], strides = [1, 1]} : vector<224x128xf32> to vector<32x32xf32>
    %8 = vector.extract_strided_slice %1 {offsets = [192, 0], sizes = [32, 32], strides = [1, 1]} : vector<224x128xf32> to vector<32x32xf32>
    %9 = vector.extract_strided_slice %2 {offsets = [0, 0], sizes = [1, 32], strides = [1, 1]} : vector<16x128xf32> to vector<1x32xf32>
    %10 = vector.extract_strided_slice %2 {offsets = [1, 0], sizes = [1, 32], strides = [1, 1]} : vector<16x128xf32> to vector<1x32xf32>
    %11 = vector.extract_strided_slice %2 {offsets = [2, 0], sizes = [1, 32], strides = [1, 1]} : vector<16x128xf32> to vector<1x32xf32>
    %12 = vector.extract_strided_slice %2 {offsets = [3, 0], sizes = [1, 32], strides = [1, 1]} : vector<16x128xf32> to vector<1x32xf32>
    %13 = vector.extract_strided_slice %2 {offsets = [4, 0], sizes = [1, 32], strides = [1, 1]} : vector<16x128xf32> to vector<1x32xf32>
    %14 = vector.extract_strided_slice %2 {offsets = [5, 0], sizes = [1, 32], strides = [1, 1]} : vector<16x128xf32> to vector<1x32xf32>
    %15 = vector.extract_strided_slice %2 {offsets = [6, 0], sizes = [1, 32], strides = [1, 1]} : vector<16x128xf32> to vector<1x32xf32>
    %16 = vector.extract_strided_slice %2 {offsets = [7, 0], sizes = [1, 32], strides = [1, 1]} : vector<16x128xf32> to vector<1x32xf32>
    %17 = vector.extract_strided_slice %2 {offsets = [8, 0], sizes = [1, 64], strides = [1, 1]} : vector<16x128xf32> to vector<1x64xf32>
    %18 = vector.extract_strided_slice %2 {offsets = [9, 0], sizes = [1, 32], strides = [1, 1]} : vector<16x128xf32> to vector<1x32xf32>
    %19 = vector.extract_strided_slice %2 {offsets = [10, 0], sizes = [2, 32], strides = [1, 1]} : vector<16x128xf32> to vector<2x32xf32>
    %cst = arith.constant dense<0.000000e+00> : vector<16xf32>
    %20 = vector.multi_reduction <add>, %0, %cst [1] : vector<16x32xf32> to vector<16xf32>
    %21 = vector.shape_cast %20 : vector<16xf32> to vector<16x1xf32>
    %cst_5 = arith.constant 3.200000e+01 : f32
    %22 = vector.broadcast %cst_5 : f32 to vector<16x1xf32>
    %23 = arith.divf %21, %22 : vector<16x1xf32>
    %24 = vector.broadcast %23 : vector<16x1xf32> to vector<16x32xf32>
    %25 = arith.subf %0, %24 : vector<16x32xf32>
    %26 = arith.mulf %25, %25 : vector<16x32xf32>
    %cst_6 = arith.constant dense<0.000000e+00> : vector<16xf32>
    %27 = vector.multi_reduction <add>, %26, %cst_6 [1] : vector<16x32xf32> to vector<16xf32>
    %28 = vector.shape_cast %27 : vector<16xf32> to vector<16x1xf32>
    %cst_7 = arith.constant 3.200000e+01 : f32
    %29 = vector.broadcast %cst_7 : f32 to vector<16x1xf32>
    %30 = arith.divf %28, %29 : vector<16x1xf32>
    %31 = vector.broadcast %23 : vector<16x1xf32> to vector<16x32xf32>
    %32 = arith.subf %0, %31 : vector<16x32xf32>
    %cst_8 = arith.constant 9.99999996E-13 : f32
    %33 = vector.broadcast %cst_8 : f32 to vector<16x1xf32>
    %34 = arith.addf %30, %33 : vector<16x1xf32>
    %35 = math.rsqrt %34 : vector<16x1xf32>
    %36 = vector.broadcast %35 : vector<16x1xf32> to vector<16x32xf32>
    %37 = arith.mulf %32, %36 : vector<16x32xf32>
    %38 = vector.broadcast %9 : vector<1x32xf32> to vector<16x32xf32>
    %39 = arith.mulf %37, %38 : vector<16x32xf32>
    %40 = vector.broadcast %10 : vector<1x32xf32> to vector<16x32xf32>
    %41 = arith.addf %39, %40 : vector<16x32xf32>
    %cst_9 = arith.constant dense<0.000000e+00> : vector<16x96xf32>
    %42 = tpu.matmul %41, %3, %cst_9 {dimension_numbers = #tpu.dot_dimension_numbers<[1], [0], [0], [1], [0, 0, 1, 1], [], []>} : vector<16x32xf32>, vector<32x96xf32>, vector<16x96xf32> -> vector<16x96xf32>
    %43 = vector.extract_strided_slice %42 {offsets = [0, 0], sizes = [16, 32], strides = [1, 1]} : vector<16x96xf32> to vector<16x32xf32>
    %44 = vector.broadcast %13 : vector<1x32xf32> to vector<16x32xf32>
    %45 = arith.addf %43, %44 : vector<16x32xf32>
    %46 = vector.shape_cast %45 : vector<16x32xf32> to vector<2x8x32xf32>
    %47 = vector.extract_strided_slice %42 {offsets = [0, 32], sizes = [16, 32], strides = [1, 1]} : vector<16x96xf32> to vector<16x32xf32>
    %48 = vector.broadcast %14 : vector<1x32xf32> to vector<16x32xf32>
    %49 = arith.addf %47, %48 : vector<16x32xf32>
    %50 = vector.shape_cast %49 : vector<16x32xf32> to vector<2x8x32xf32>
    %51 = vector.extract_strided_slice %42 {offsets = [0, 64], sizes = [16, 32], strides = [1, 1]} : vector<16x96xf32> to vector<16x32xf32>
    %52 = vector.broadcast %15 : vector<1x32xf32> to vector<16x32xf32>
    %53 = arith.addf %51, %52 : vector<16x32xf32>
    %54 = vector.shape_cast %53 : vector<16x32xf32> to vector<2x8x32xf32>
    %55 = tpu.transpose %50, [0, 2, 1] : vector<2x8x32xf32> -> vector<2x32x8xf32>
    %56 = tpu.concatenate %55, %55, %55, %55 in 2 : vector<2x32x8xf32>, vector<2x32x8xf32>, vector<2x32x8xf32>, vector<2x32x8xf32> -> vector<2x32x32xf32>
    %57 = vector.shape_cast %8 : vector<32x32xf32> to vector<1x32x32xf32>
    %58 = vector.broadcast %57 : vector<1x32x32xf32> to vector<2x32x32xf32>
    %59 = arith.mulf %56, %58 : vector<2x32x32xf32>
    %60 = tpu.concatenate %54, %54, %54, %54 in 1 : vector<2x8x32xf32>, vector<2x8x32xf32>, vector<2x8x32xf32>, vector<2x8x32xf32> -> vector<2x32x32xf32>
    %61 = vector.shape_cast %7 : vector<32x32xf32> to vector<1x32x32xf32>
    %62 = vector.broadcast %61 : vector<1x32x32xf32> to vector<2x32x32xf32>
    %63 = arith.mulf %60, %62 : vector<2x32x32xf32>
    "tpu.trace_start"() <{level = 10 : i32, message = "bqc,bck->bqk"}> : () -> ()
    %cst_10 = arith.constant dense<0.000000e+00> : vector<2x8x32xf32>
    %64 = tpu.matmul %46, %59, %cst_10 {dimension_numbers = #tpu.dot_dimension_numbers<[2], [1], [1], [2], [0, 0, 0, 1, 1, 2], [0], [0]>} : vector<2x8x32xf32>, vector<2x32x32xf32>, vector<2x8x32xf32> -> vector<2x8x32xf32>
    "tpu.trace_stop"() : () -> ()
    %cst_11 = arith.constant 0.353553385 : f32
    %65 = vector.broadcast %cst_11 : f32 to vector<2x8x32xf32>
    %66 = arith.mulf %64, %65 : vector<2x8x32xf32>
    %67 = vector.shape_cast %19 : vector<2x32xf32> to vector<2x1x32xf32>
    %68 = vector.broadcast %67 : vector<2x1x32xf32> to vector<2x8x32xf32>
    %69 = arith.addf %66, %68 : vector<2x8x32xf32>
    %70 = vector.extract_strided_slice %69 {offsets = [0, 0, 0], sizes = [2, 8, 8], strides = [1, 1, 1]} : vector<2x8x32xf32> to vector<2x8x8xf32>
    %cst_12 = arith.constant dense<0xFF800000> : vector<2x8xf32>
    %71 = vector.multi_reduction <maximumf>, %70, %cst_12 [2] : vector<2x8x8xf32> to vector<2x8xf32>
    %72 = vector.shape_cast %71 : vector<2x8xf32> to vector<2x8x1xf32>
    %73 = vector.shape_cast %72 : vector<2x8x1xf32> to vector<2x8x1xf32>
    %74 = vector.broadcast %73 : vector<2x8x1xf32> to vector<2x8x8xf32>
    %75 = vector.extract_strided_slice %69 {offsets = [0, 0, 8], sizes = [2, 8, 8], strides = [1, 1, 1]} : vector<2x8x32xf32> to vector<2x8x8xf32>
    %cst_13 = arith.constant dense<0xFF800000> : vector<2x8xf32>
    %76 = vector.multi_reduction <maximumf>, %75, %cst_13 [2] : vector<2x8x8xf32> to vector<2x8xf32>
    %77 = vector.shape_cast %76 : vector<2x8xf32> to vector<2x8x1xf32>
    %78 = vector.shape_cast %77 : vector<2x8x1xf32> to vector<2x8x1xf32>
    %79 = vector.broadcast %78 : vector<2x8x1xf32> to vector<2x8x8xf32>
    %80 = vector.extract_strided_slice %69 {offsets = [0, 0, 16], sizes = [2, 8, 8], strides = [1, 1, 1]} : vector<2x8x32xf32> to vector<2x8x8xf32>
    %cst_14 = arith.constant dense<0xFF800000> : vector<2x8xf32>
    %81 = vector.multi_reduction <maximumf>, %80, %cst_14 [2] : vector<2x8x8xf32> to vector<2x8xf32>
    %82 = vector.shape_cast %81 : vector<2x8xf32> to vector<2x8x1xf32>
    %83 = vector.shape_cast %82 : vector<2x8x1xf32> to vector<2x8x1xf32>
    %84 = vector.broadcast %83 : vector<2x8x1xf32> to vector<2x8x8xf32>
    %85 = vector.extract_strided_slice %69 {offsets = [0, 0, 24], sizes = [2, 8, 8], strides = [1, 1, 1]} : vector<2x8x32xf32> to vector<2x8x8xf32>
    %cst_15 = arith.constant dense<0xFF800000> : vector<2x8xf32>
    %86 = vector.multi_reduction <maximumf>, %85, %cst_15 [2] : vector<2x8x8xf32> to vector<2x8xf32>
    %87 = vector.shape_cast %86 : vector<2x8xf32> to vector<2x8x1xf32>
    %88 = vector.shape_cast %87 : vector<2x8x1xf32> to vector<2x8x1xf32>
    %89 = vector.broadcast %88 : vector<2x8x1xf32> to vector<2x8x8xf32>
    %90 = tpu.concatenate %74, %79, %84, %89 in 2 : vector<2x8x8xf32>, vector<2x8x8xf32>, vector<2x8x8xf32>, vector<2x8x8xf32> -> vector<2x8x32xf32>
    %91 = arith.subf %69, %90 : vector<2x8x32xf32>
    %92 = math.exp %91 : vector<2x8x32xf32>
    "tpu.trace_start"() <{level = 10 : i32, message = "bqk,bkc->bqc"}> : () -> ()
    %cst_16 = arith.constant dense<0.000000e+00> : vector<2x8x32xf32>
    %93 = tpu.matmul %92, %63, %cst_16 {dimension_numbers = #tpu.dot_dimension_numbers<[2], [1], [1], [2], [0, 0, 0, 1, 1, 2], [0], [0]>} : vector<2x8x32xf32>, vector<2x32x32xf32>, vector<2x8x32xf32> -> vector<2x8x32xf32>
    "tpu.trace_stop"() : () -> ()
    %94 = vector.shape_cast %93 : vector<2x8x32xf32> to vector<16x32xf32>
    %95 = vector.shape_cast %92 : vector<2x8x32xf32> to vector<16x32xf32>
    %cst_17 = arith.constant dense<0.000000e+00> : vector<16x32xf32>
    %96 = tpu.matmul %95, %7, %cst_17 {dimension_numbers = #tpu.dot_dimension_numbers<[1], [0], [0], [1], [0, 0, 1, 1], [], []>} : vector<16x32xf32>, vector<32x32xf32>, vector<16x32xf32> -> vector<16x32xf32>
    %97 = tpu.reciprocal %96 {approx = true} : vector<16x32xf32> -> vector<16x32xf32>
    %98 = arith.mulf %94, %97 : vector<16x32xf32>
    %cst_18 = arith.constant dense<0.000000e+00> : vector<16x32xf32>
    %99 = tpu.matmul %98, %4, %cst_18 {dimension_numbers = #tpu.dot_dimension_numbers<[1], [0], [0], [1], [0, 0, 1, 1], [], []>} : vector<16x32xf32>, vector<32x32xf32>, vector<16x32xf32> -> vector<16x32xf32>
    %100 = vector.broadcast %16 : vector<1x32xf32> to vector<16x32xf32>
    %101 = arith.addf %99, %100 : vector<16x32xf32>
    %102 = arith.addf %101, %101 : vector<16x32xf32>
    %cst_19 = arith.constant dense<0.000000e+00> : vector<16xf32>
    %103 = vector.multi_reduction <add>, %102, %cst_19 [1] : vector<16x32xf32> to vector<16xf32>
    %104 = vector.shape_cast %103 : vector<16xf32> to vector<16x1xf32>
    %cst_20 = arith.constant 3.200000e+01 : f32
    %105 = vector.broadcast %cst_20 : f32 to vector<16x1xf32>
    %106 = arith.divf %104, %105 : vector<16x1xf32>
    %107 = vector.broadcast %106 : vector<16x1xf32> to vector<16x32xf32>
    %108 = arith.subf %102, %107 : vector<16x32xf32>
    %109 = arith.mulf %108, %108 : vector<16x32xf32>
    %cst_21 = arith.constant dense<0.000000e+00> : vector<16xf32>
    %110 = vector.multi_reduction <add>, %109, %cst_21 [1] : vector<16x32xf32> to vector<16xf32>
    %111 = vector.shape_cast %110 : vector<16xf32> to vector<16x1xf32>
    %cst_22 = arith.constant 3.200000e+01 : f32
    %112 = vector.broadcast %cst_22 : f32 to vector<16x1xf32>
    %113 = arith.divf %111, %112 : vector<16x1xf32>
    %114 = vector.broadcast %106 : vector<16x1xf32> to vector<16x32xf32>
    %115 = arith.subf %102, %114 : vector<16x32xf32>
    %cst_23 = arith.constant 9.99999996E-13 : f32
    %116 = vector.broadcast %cst_23 : f32 to vector<16x1xf32>
    %117 = arith.addf %113, %116 : vector<16x1xf32>
    %118 = math.rsqrt %117 : vector<16x1xf32>
    %119 = vector.broadcast %118 : vector<16x1xf32> to vector<16x32xf32>
    %120 = arith.mulf %115, %119 : vector<16x32xf32>
    %121 = vector.broadcast %11 : vector<1x32xf32> to vector<16x32xf32>
    %122 = arith.mulf %120, %121 : vector<16x32xf32>
    %123 = vector.broadcast %12 : vector<1x32xf32> to vector<16x32xf32>
    %124 = arith.addf %122, %123 : vector<16x32xf32>
    %cst_24 = arith.constant dense<0.000000e+00> : vector<16x64xf32>
    %125 = tpu.matmul %124, %5, %cst_24 {dimension_numbers = #tpu.dot_dimension_numbers<[1], [0], [0], [1], [0, 0, 1, 1], [], []>} : vector<16x32xf32>, vector<32x64xf32>, vector<16x64xf32> -> vector<16x64xf32>
    %126 = vector.broadcast %17 : vector<1x64xf32> to vector<16x64xf32>
    %127 = arith.addf %125, %126 : vector<16x64xf32>
    %cst_25 = arith.constant 5.000000e-01 : f32
    %128 = vector.broadcast %cst_25 : f32 to vector<16x64xf32>
    %129 = arith.mulf %128, %127 : vector<16x64xf32>
    %cst_26 = arith.constant 4.471500e-02 : f32
    %130 = vector.broadcast %cst_26 : f32 to vector<16x64xf32>
    %131 = arith.mulf %130, %127 : vector<16x64xf32>
    %132 = arith.mulf %131, %127 : vector<16x64xf32>
    %133 = arith.mulf %132, %127 : vector<16x64xf32>
    %134 = arith.addf %127, %133 : vector<16x64xf32>
    %cst_27 = arith.constant 0.797884583 : f32
    %135 = vector.broadcast %cst_27 : f32 to vector<16x64xf32>
    %136 = arith.mulf %135, %134 : vector<16x64xf32>
    %137 = math.tanh %136 : vector<16x64xf32>
    %cst_28 = arith.constant 1.000000e+00 : f32
    %138 = vector.broadcast %cst_28 : f32 to vector<16x64xf32>
    %139 = arith.addf %138, %137 : vector<16x64xf32>
    %140 = arith.mulf %129, %139 : vector<16x64xf32>
    %cst_29 = arith.constant dense<0.000000e+00> : vector<16x32xf32>
    %141 = tpu.matmul %140, %6, %cst_29 {dimension_numbers = #tpu.dot_dimension_numbers<[1], [0], [0], [1], [0, 0, 1, 1], [], []>} : vector<16x64xf32>, vector<64x32xf32>, vector<16x32xf32> -> vector<16x32xf32>
    %142 = arith.addf %102, %141 : vector<16x32xf32>
    %143 = vector.broadcast %18 : vector<1x32xf32> to vector<16x32xf32>
    %144 = arith.addf %142, %143 : vector<16x32xf32>
    %145 = vector.shape_cast %69 : vector<2x8x32xf32> to vector<16x32xf32>
    %146 = tpu.concatenate %144, %145 in 1 : vector<16x32xf32>, vector<16x32xf32> -> vector<16x64xf32>
    %c0_30 = arith.constant 0 : index
    %c0_31 = arith.constant 0 : index
    %147 = vector.load %arg4[%c0_30, %c0_31] : memref<16x64xf32, #tpu.memory_space<vmem>>, vector<16x64xf32>
    tpu.vector_store %arg4[%c0_30, %c0_31], %146 {strides = array<i32>} : memref<16x64xf32, #tpu.memory_space<vmem>>, vector<16x64xf32>,
    return
  }
  func.func @transform_0(%arg0: i32) -> (i32, i32) {
    %c0_i32 = arith.constant 0 : i32
    %c0_i32_0 = arith.constant 0 : i32
    %c0_i32_1 = arith.constant 0 : i32
    return %c0_i32, %c0_i32_0 : i32, i32
  }
  func.func @transform_1(%arg0: i32) -> (i32, i32) {
    %c0_i32 = arith.constant 0 : i32
    %c0_i32_0 = arith.constant 0 : i32
    %c0_i32_1 = arith.constant 0 : i32
    return %c0_i32, %c0_i32_0 : i32, i32
  }
  func.func @transform_2(%arg0: i32) -> (i32, i32) {
    %c0_i32 = arith.constant 0 : i32
    %c0_i32_0 = arith.constant 0 : i32
    %c0_i32_1 = arith.constant 0 : i32
    return %c0_i32, %c0_i32_0 : i32, i32
  }
  func.func @transform_3(%arg0: i32) -> (i32, i32) {
    %c0_i32 = arith.constant 0 : i32
    %c0_i32_0 = arith.constant 0 : i32
    %c0_i32_1 = arith.constant 0 : i32
    return %c0_i32, %c0_i32_0 : i32, i32
  }
}

</mosaic_0001>

<bundles_post_ra>
// kernel: transformer_layer.1
= control target key start
LH: loop header
LB: loop body
LE: loop exit
PB: predicated region body
PF: predicated region fallthrough
CT: control target
= control target key end

     0   :  { %vm46_vm0 = vcmask 261120   ;;  %v74_v20 = vlaneseq  ;;  %s1516_s25 = smov 32   ;;  %s1517_s26 = smov 96   ;;  %v1520_v53 = vmov 0.0|0.0   ;;  %vm1522_vm1 = vmmov 0   ;;  %s1882_s0 = inlined_call_operand.vmem [shape: f32[16,32], index: 0, kind: input, shape index: {}]   ;;  %s1883_s1 = inlined_call_operand.vmem [shape: f32[224,128], index: 1, kind: input, shape index: {}]   ;;  %s1884_s2 = inlined_call_operand.vmem [shape: f32[16,128], index: 2, kind: input, shape index: {}]   ;;  %s1885_s3 = inlined_call_operand.vmem [shape: f32[16,64], index: 3, kind: output, shape index: {}]  }
   0x1   :  { %v14_v0 = vld [vmem:[%s1882_s0] sm:$0xff]  ;;  %v15_v1 = vld [vmem:[%s1882_s0 + $0x8] sm:$0xff]  ;;  %v18_v16 = vld [vmem:[%s1883_s1 + $0x10] sm:$0xff]  ;;  %s1518_s27 = smov 8   ;;  %s1519_s28 = smov 16   ;;  %1408 = vmatprep.subr.bf16.mxu0 %v1520_v53  ;;  %v1523_v59 = vmov 0.0  }
   0x2   :  { %v47_v2 = vsel %vm46_vm0, %v14_v0, 0.0  ;;  %v50_v3 = vsel %vm46_vm0, %v15_v1, 0.0  ;;  %v16_v14 = vld [vmem:[%s1883_s1] sm:$0xff]  ;;  %v17_v15 = vld [vmem:[%s1883_s1 + $0x8] sm:$0xff]  ;;  %v19_v18 = vld [vmem:[%s1883_s1 + $0x18] sm:$0xff]  ;;  %v1568_v21 = vshrl.u32 %v74_v20, 7  ;;  %1317 = vmatprep.mubr.msk.f32.mxu0 %vm1522_vm1, %v1523_v59 }
   0x3   :  { %48 = vadd.xlane.f32.xlu0 %v47_v2  ;;  %v1394_v17 = vpack.c.bf16 %v17_v15, %v16_v14  ;;  %v1398_v19 = vpack.c.bf16 %v19_v18, %v18_v16  ;;  %v1574_v23 = vld [vmem:[%s1884_s2] sm:$0xff]  ;;  %s1521_s29 = smov 24   ;;  %s1524_s30 = smov 64   ;;  %v1658_v62 = vld [vmem:[%s1883_s1 + $0xa8] sm:$0xff]  ;;  %vm345_vm2 = vcmask 64512   ;;  %vm354_vm3 = vcmask 130048  }
   0x4   :  { %v175_v22 = vsub.s32 5, %v1568_v21  ;;  %v1579_v31 = vsub.s32 0, %v1568_v21  ;;  %v82_v32 = vsub.s32 1, %v1568_v21  ;;  %v185_v60 = vsub.s32 6, %v1568_v21  ;;  %v1663_v63 = vld [vmem:[%s1883_s1 + $0xa0] sm:$0xff]  ;;  %v41_v14 = vld [vmem:[%s1883_s1 + $0xc8] sm:$0xff] }
   0x5   :  { %1395 = vmatprep.subr.bf16.mxu1 %v1394_v17  ;;  %vm363_vm4 = vcmask 195584   ;;  %vm595_vm5 = vcmask 130112   ;;  %vm609_vm6 = vcmask 261312   ;;  %vm602_vm7 = vcmask 195712  }
   0x6   :  { %1397 = vmatpush3.bf16.msra.mxu1 %v1394_v17  ;;  %v176_v24 = vrot.slane %v1574_v23, %v175_v22  ;;  %v77_v33 = vrot.slane %v1574_v23, %v1579_v31  ;;  %v83_v36 = vrot.slane %v1574_v23, %v82_v32  ;;  %v186_v61 = vrot.slane %v1574_v23, %v185_v60 }
   0x7   :  { %51 = vadd.xlane.f32.xlu0 %v50_v3  ;;  %1399 = vmatprep.subr.bf16.mxu1 %v1398_v19  ;;  %vm1113_vm8 = vcmask 523264  }
   0xa   :  { %1401 = vmatpush3.bf16.msra.mxu1 %v1398_v19 }
   0xb   :  { %1402 = vmatprep.subr.bf16.mxu1 %v1520_v53 }
  0x1d   :  { %178 = vrot.lane.b32.xlu0 %v176_v24, %s1516_s25 }
  0x90   :  { %v49_v4 = vpop.xlane.xlu0 %48 }
  0x91   :  { %v54_v5 = vmul.f32 0.03125, %v49_v4 }
  0x93   :  { %v56_v6 = vsub.f32 %v14_v0, %v54_v5  ;;  %v1672_v0 = vld [vmem:[%s1883_s1 + $0xb8] sm:$0xff] }
  0x94   :  { %v52_v7 = vpop.xlane.xlu0 %51 }
  0x95   :  { %v55_v8 = vmul.f32 0.03125, %v52_v7  ;;  %v58_v9 = vmul.f32 %v56_v6, %v56_v6 }
  0x97   :  { %v57_v10 = vsub.f32 %v15_v1, %v55_v8  ;;  %v60_v11 = vsel %vm46_vm0, %v58_v9, 0.0  ;;  %v1677_v1 = vld [vmem:[%s1883_s1 + $0xb0] sm:$0xff] }
  0x98   :  { %61 = vadd.xlane.f32.xlu1 %v60_v11  ;;  %v179_v43 = vpop.permute.xlu0 %178 }
  0x99   :  { %v59_v12 = vmul.f32 %v57_v10, %v57_v10 }
  0x9b   :  { %v63_v13 = vsel %vm46_vm0, %v59_v12, 0.0  ;;  %v40_v12 = vld [vmem:[%s1883_s1 + $0xc0] sm:$0xff] }
  0x9c   :  { %64 = vadd.xlane.f32.xlu1 %v63_v13 }
 0x125   :  { %v62_v25 = vpop.xlane.xlu1 %61 }
 0x126   :  { %v66_v26 = vmul.f32 0.03125, %v62_v25 }
 0x128   :  { %v68_v27 = vadd.f32 1e-12, %v66_v26 }
 0x129   :  { %v65_v28 = vpop.xlane.xlu1 %64 }
 0x12a   :  { %1496 = vrsqrt.f32 %v68_v27  ;;  %v67_v29 = vmul.f32 0.03125, %v65_v28 }
 0x12c   :  { %v69_v30 = vadd.f32 1e-12, %v67_v29 }
 0x12e   :  { %1498 = vrsqrt.f32 %v69_v30 }
 0x134   :  { %v1497_v34 = vpop.eup %1496 }
 0x135   :  { %v72_v35 = vmul.f32 %v1497_v34, %v56_v6 }
 0x137   :  { %v78_v37 = vmul.f32 %v77_v33, %v72_v35 }
 0x138   :  { %v1499_v38 = vpop.eup %1498 }
 0x139   :  { %v73_v39 = vmul.f32 %v1499_v38, %v57_v10  ;;  %v84_v40 = vadd.f32 %v83_v36, %v78_v37 }
 0x13b   :  { %v79_v41 = vmul.f32 %v77_v33, %v73_v39  ;;  %1295 = vmatprep.mubr.msk.f32.mxu1 %vm46_vm0, %v84_v40 }
 0x13d   :  { %v85_v42 = vadd.f32 %v83_v36, %v79_v41 }
 0x13f   :  { %1296 = vmatmul.mubr.msk.f32.vlgmr.msra.gmra.mrb[0].mxu1 %vm46_vm0, %v85_v42 }
 0x140   :  { %1306 = vmatprep.mubr.msk.f32.mxu1 %vm1522_vm1, %v1523_v59 }
 0x212   :  { %v1589_v44 = vpop.f32.mrb[0].mxu1 }
 0x213   :  { %v182_v45 = vadd.f32 %v1589_v44, %v179_v43  ;;  %v1592_v46 = vpop.f32.mrb[1].mxu1 }
 0x214   :  { %v181_v47 = vadd.f32 %v179_v43, %v1592_v46 }
 0x215   :  { %197 = vrot.lane.b32.xlu1 %v182_v45, %s1517_s26 }
 0x219   :  { %195 = vrot.lane.b32.xlu1 %v181_v47, %s1517_s26 }
 0x287   :  { %v198_v48 = vpop.permute.xlu1 %197 }
 0x288   :  { %233 = vxpose.xlu0.b32.start.end [1/1] (short) (narrow) %v198_v48, 32 }
 0x28b   :  { %v196_v49 = vpop.permute.xlu1 %195 }
 0x28c   :  { %201 = vxpose.xlu1.b32.start.end [1/1] (short) (narrow) %v196_v49, 32  ;;  %v169_v49 = vsub.s32 4, %v1568_v21 }
 0x308   :  { %v1595_v50 = vpop.trf.xlu0 }
 0x309   :  { %281 = vrot.lane.b32.xlu1 %v1595_v50, %s1518_s27 }
 0x30c   :  { %v1598_v51 = vpop.trf.xlu1  ;;  %v250_v52 = vpop.trf.xlu0 }
 0x30d   :  { %305 = vrot.lane.b32.xlu1 %v1595_v50, %s1519_s28  ;;  %273 = vrot.lane.b32.xlu0 %v1598_v51, %s1518_s27 }
 0x310   :  { %v1613_v54 = vpop.trf.xlu1  ;;  %v1615_v55 = vpop.trf.xlu0 }
 0x311   :  { %329 = vrot.lane.b32.xlu1 %v1595_v50, %s1521_s29  ;;  %283 = vrot.lane.b32.xlu0 %v250_v52, %s1518_s27 }
 0x314   :  { %v1620_v56 = vpop.trf.xlu1  ;;  %v1625_v57 = vpop.trf.xlu0 }
 0x315   :  { %297 = vrot.lane.b32.xlu1 %v1598_v51, %s1519_s28  ;;  %307 = vrot.lane.b32.xlu0 %v250_v52, %s1519_s28 }
 0x318   :  { %v1629_v58 = vpop.trf.xlu1 }
 0x319   :  { %321 = vrot.lane.b32.xlu1 %v1598_v51, %s1521_s29  ;;  %331 = vrot.lane.b32.xlu0 %v250_v52, %s1521_s29 }
 0x31d   :  { %299 = vrot.lane.b32.xlu0 %v1613_v54, %s1519_s28  ;;  %275 = vrot.lane.b32.xlu1 %v1613_v54, %s1518_s27 }
 0x321   :  { %323 = vrot.lane.b32.xlu0 %v1613_v54, %s1521_s29  ;;  %285 = vrot.lane.b32.xlu1 %v1615_v55, %s1518_s27 }
 0x325   :  { %287 = vrot.lane.b32.xlu0 %v1625_v57, %s1518_s27  ;;  %277 = vrot.lane.b32.xlu1 %v1620_v56, %s1518_s27 }
 0x329   :  { %301 = vrot.lane.b32.xlu1 %v1620_v56, %s1519_s28  ;;  %279 = vrot.lane.b32.xlu0 %v1629_v58, %s1518_s27 }
 0x32d   :  { %325 = vrot.lane.b32.xlu1 %v1620_v56, %s1521_s29  ;;  %303 = vrot.lane.b32.xlu0 %v1629_v58, %s1519_s28 }
 0x331   :  { %309 = vrot.lane.b32.xlu1 %v1615_v55, %s1519_s28  ;;  %327 = vrot.lane.b32.xlu0 %v1629_v58, %s1521_s29 }
 0x335   :  { %333 = vrot.lane.b32.xlu1 %v1615_v55, %s1521_s29  ;;  %311 = vrot.lane.b32.xlu0 %v1625_v57, %s1519_s28 }
 0x339   :  { %188 = vrot.lane.b32.xlu1 %v186_v61, %s1524_s30  ;;  %335 = vrot.lane.b32.xlu0 %v1625_v57, %s1521_s29 }
 0x33d   :  { %386 = vrot.lane.b32.xlu1 %v1658_v62, %s1524_s30  ;;  %384 = vrot.lane.b32.xlu0 %v1663_v63, %s1524_s30 }
 0x341   :  { %390 = vrot.lane.b32.xlu1 %v1672_v0, %s1524_s30  ;;  %388 = vrot.lane.b32.xlu0 %v1677_v1, %s1524_s30 }
 0x37b   :  { %v282_v2 = vpop.permute.xlu1 %281 }
 0x37c   :  { %v350_v9 = vsel %vm345_vm2, %v1595_v50, %v282_v2 }
 0x37f   :  { %v274_v3 = vpop.permute.xlu0 %273  ;;  %v306_v4 = vpop.permute.xlu1 %305 }
 0x380   :  { %v359_v10 = vsel %vm354_vm3, %v350_v9, %v306_v4  ;;  %v346_v26 = vsel %vm345_vm2, %v1598_v51, %v274_v3  ;;  %v42_v51 = vld [vmem:[%s1883_s1 + $0xd0] sm:$0xff] }
 0x383   :  { %v284_v5 = vpop.permute.xlu0 %283  ;;  %v330_v6 = vpop.permute.xlu1 %329 }
 0x384   :  { %v351_v11 = vsel %vm345_vm2, %v250_v52, %v284_v5  ;;  %v368_v13 = vsel %vm363_vm4, %v359_v10, %v330_v6 }
 0x385   :  { %v376_v19 = vmul.f32 %v368_v13, %v40_v12 }
 0x387   :  { %v308_v7 = vpop.permute.xlu0 %307  ;;  %v298_v8 = vpop.permute.xlu1 %297 }
 0x388   :  { %v360_v15 = vsel %vm354_vm3, %v351_v11, %v308_v7  ;;  %v355_v28 = vsel %vm354_vm3, %v346_v26, %v298_v8 }
 0x38b   :  { %v332_v16 = vpop.permute.xlu0 %331  ;;  %v322_v17 = vpop.permute.xlu1 %321 }
 0x38c   :  { %v369_v18 = vsel %vm363_vm4, %v360_v15, %v332_v16  ;;  %v364_v29 = vsel %vm363_vm4, %v355_v28, %v322_v17 }
 0x38d   :  { %v377_v20 = vmul.f32 %v369_v18, %v41_v14  ;;  %v372_v36 = vmul.f32 %v364_v29, %v40_v12  ;;  %v1525_v18 = vmov 1966171168  }
 0x38f   :  { %v300_v22 = vpop.permute.xlu0 %299  ;;  %v276_v24 = vpop.permute.xlu1 %275  ;;  %v1409_v25 = vpack.c.bf16 %v377_v20, %v376_v19  ;;  %v554_v19 = vunpack.c.l.s4 %v1525_v18 }
 0x390   :  { %v347_v27 = vsel %vm345_vm2, %v1613_v54, %v276_v24  ;;  %v43_v54 = vld [vmem:[%s1883_s1 + $0xd8] sm:$0xff]  ;;  %v1744_v24 = vld [vmem:[%s1884_s2 + $0x8] sm:$0xff] }
 0x391   :  { %1410 = vmatpush3.bf16.msra.mxu0 %v1409_v25  ;;  %v356_v33 = vsel %vm354_vm3, %v347_v27, %v300_v22  ;;  %v555_v20 = vunpack.c.0.s8 %v554_v19 }
 0x392   :  { %1411 = vmatprep.subr.bf16.mxu0 %v1520_v53 }
 0x393   :  { %v324_v30 = vpop.permute.xlu0 %323  ;;  %v286_v34 = vpop.permute.xlu1 %285  ;;  %v558_v22 = vsub.s32 %v555_v20, %v1568_v21 }
 0x394   :  { %v365_v35 = vsel %vm363_vm4, %v356_v33, %v324_v30  ;;  %v352_v8 = vsel %vm345_vm2, %v1615_v55, %v286_v34 }
 0x395   :  { %v373_v37 = vmul.f32 %v365_v35, %v41_v14  ;;  %v559_v25 = vrot.slane %v1744_v24, %v558_v22 }
 0x397   :  { %v1403_v38 = vpack.c.bf16 %v373_v37, %v372_v36  ;;  %v288_v39 = vpop.permute.xlu0 %287  ;;  %v278_v40 = vpop.permute.xlu1 %277  ;;  %v560_v26 = vcombine.high %v559_v25, %v559_v25  ;;  %v567_v33 = vrot.slane %v559_v25, %v558_v22 }
 0x398   :  { %v348_v47 = vsel %vm345_vm2, %v1620_v56, %v278_v40  ;;  %v353_v11 = vsel %vm345_vm2, %v1625_v57, %v288_v39 }
 0x399   :  { %1404 = vmatpush3.bf16.msra.mxu1 %v1403_v38  ;;  %v574_v27 = vrot.slane %v560_v26, %v558_v22  ;;  %v575_v35 = vcombine.high %v567_v33, %v567_v33 }
 0x39a   :  { %1405 = vmatprep.subr.bf16.mxu1 %v1520_v53 }
 0x39b   :  { %v280_v41 = vpop.permute.xlu0 %279  ;;  %v302_v42 = vpop.permute.xlu1 %301  ;;  %v576_v30 = vcombine.high %v574_v27, %v574_v27  ;;  %v580_v40 = vrot.slane %v575_v35, %v1579_v31 }
 0x39c   :  { %v357_v48 = vsel %vm354_vm3, %v348_v47, %v302_v42  ;;  %v349_v50 = vsel %vm345_vm2, %v1629_v58, %v280_v41  ;;  %v170_v58 = vrot.slane %v1574_v23, %v169_v49 }
 0x39e   :  { %v171_v10 = vadd.f32 %v170_v58, %v1592_v46  ;;  %v172_v57 = vadd.f32 %v1589_v44, %v170_v58 }
 0x39f   :  { %v304_v43 = vpop.permute.xlu0 %303  ;;  %v326_v45 = vpop.permute.xlu1 %325 }
 0x3a0   :  { %v366_v52 = vsel %vm363_vm4, %v357_v48, %v326_v45  ;;  %v358_v60 = vsel %vm354_vm3, %v349_v50, %v304_v43 }
 0x3a1   :  { %v374_v3 = vmul.f32 %v366_v52, %v42_v51 }
 0x3a3   :  { %v328_v56 = vpop.permute.xlu0 %327  ;;  %v310_v61 = vpop.permute.xlu1 %309 }
 0x3a4   :  { %v367_v2 = vsel %vm363_vm4, %v358_v60, %v328_v56  ;;  %v361_v9 = vsel %vm354_vm3, %v352_v8, %v310_v61 }
 0x3a5   :  { %v375_v4 = vmul.f32 %v367_v2, %v43_v54 }
 0x3a7   :  { %v1406_v5 = vpack.c.bf16 %v375_v4, %v374_v3  ;;  %v312_v6 = vpop.permute.xlu0 %311  ;;  %v334_v7 = vpop.permute.xlu1 %333 }
 0x3a8   :  { %v370_v12 = vsel %vm363_vm4, %v361_v9, %v334_v7  ;;  %v362_v13 = vsel %vm354_vm3, %v353_v11, %v312_v6 }
 0x3a9   :  { %1407 = vmatpush3.bf16.msra.mxu1 %v1406_v5  ;;  %v378_v55 = vmul.f32 %v370_v12, %v42_v51 }
 0x3aa   :  { %1414 = vmatprep.subr.bf16.mxu1 %v1520_v53 }
 0x3ab   :  { %v336_v14 = vpop.permute.xlu0 %335  ;;  %v189_v48 = vpop.permute.xlu1 %188 }
 0x3ac   :  { %v371_v15 = vsel %vm363_vm4, %v362_v13, %v336_v14  ;;  %1307 = vmatmul.mubr.msk.f32.vlgmr.msra.gmra.mrb[2].mxu1 %vm46_vm0, %v171_v10  ;;  %v191_v2 = vadd.f32 %v189_v48, %v1592_v46  ;;  %v192_v58 = vadd.f32 %v1589_v44, %v189_v48 }
 0x3ad   :  { %v379_v16 = vmul.f32 %v371_v15, %v43_v54  ;;  %1328 = vmatprep.mubr.msk.f32.mxu1 %vm1522_vm1, %v1523_v59 }
 0x3af   :  { %v1412_v17 = vpack.c.bf16 %v379_v16, %v378_v55  ;;  %v385_v51 = vpop.permute.xlu0 %384  ;;  %v387_v52 = vpop.permute.xlu1 %386 }
 0x3b0   :  { %v400_v5 = vmul.f32 %v385_v51, %v192_v58  ;;  %v401_v6 = vmul.f32 %v387_v52, %v192_v58  ;;  %v396_v12 = vmul.f32 %v385_v51, %v191_v2  ;;  %v397_v13 = vmul.f32 %v387_v52, %v191_v2 }
 0x3b1   :  { %1413 = vmatpush3.bf16.msra.mxu0 %v1412_v17  ;;  %v1426_v52 = vpack.c.bf16 %v1658_v62, %v1663_v63  ;;  %v21_v62 = vld [vmem:[%s1883_s1 + $0x28] sm:$0xff] }
 0x3b2   :  { %1420 = vmatprep.subr.bf16.mxu0 %v1520_v53  ;;  %v1486_v8 = vpack.i.bf16 %v401_v6, %v400_v5  ;;  %v1476_v46 = vpack.i.bf16 %v397_v13, %v396_v12  ;;  %v887_v12 = vsub.s32 7, %v1568_v21 }
 0x3b3   :  { %v389_v56 = vpop.permute.xlu0 %388  ;;  %v391_v61 = vpop.permute.xlu1 %390 }
 0x3b4   :  { %1318 = vmatmul.mubr.msk.f32.vlgmr.msra.gmra.mrb[0].mxu0 %vm46_vm0, %v172_v57  ;;  %v398_v3 = vmul.f32 %v389_v56, %v191_v2  ;;  %v399_v4 = vmul.f32 %v391_v61, %v191_v2  ;;  %v402_v9 = vmul.f32 %v389_v56, %v192_v58  ;;  %v403_v10 = vmul.f32 %v391_v61, %v192_v58 }
 0x3b5   :  { %1339 = vmatprep.mubr.msk.f32.mxu0 %vm1522_vm1, %v1523_v59  ;;  %v584_v59 = vrot.slane %v576_v30, %v1579_v31  ;;  %v1430_v56 = vpack.c.bf16 %v1672_v0, %v1677_v1  ;;  %v22_v0 = vld [vmem:[%s1883_s1 + $0x30] sm:$0xff]  ;;  %v23_v1 = vld [vmem:[%s1883_s1 + $0x38] sm:$0xff]  ;;  %v888_v13 = vrot.slane %v1574_v23, %v887_v12 }
 0x3b6   :  { %v1481_v7 = vpack.i.bf16 %v399_v4, %v398_v3  ;;  %v1491_v11 = vpack.i.bf16 %v403_v10, %v402_v9  ;;  %v1438_v2 = vpack.c.bf16 %v23_v1, %v22_v0  ;;  %v31_v1 = vld [vmem:[%s1883_s1 + $0x78] sm:$0xff] }
 0x47f   :  { %v473_v28 = vpop.f32.mrb[2].mxu1 }
 0x480   :  { %v1308_v29 = vpop.f32.mrb[3].mxu1  ;;  %v550_v39 = vmul.f32 0.35355338, %v473_v28 }
 0x482   :  { %v1754_v43 = vadd.f32 %v580_v40, %v550_v39 }
 0x484   :  { %v596_v49 = vsel %vm595_vm5, %v1754_v43, -inf  ;;  %v589_v50 = vsel %vm345_vm2, %v1754_v43, -inf  ;;  %v603_v54 = vsel %vm602_vm7, %v1754_v43, -inf  ;;  %v610_v60 = vsel %vm609_vm6, %v1754_v43, -inf }
 0x487   :  { %v546_v34 = vpop.f32.mrb[0].mxu0 }
 0x488   :  { %v551_v36 = vmul.f32 0.35355338, %v546_v34  ;;  %v1319_v37 = vpop.f32.mrb[1].mxu0 }
 0x48a   :  { %v1748_v38 = vadd.f32 %v584_v59, %v551_v36 }
 0x48c   :  { %v599_v41 = vsel %vm595_vm5, %v1748_v38, -inf  ;;  %v592_v42 = vsel %vm345_vm2, %v1748_v38, -inf  ;;  %v613_v45 = vsel %vm609_vm6, %v1748_v38, -inf  ;;  %v606_v47 = vsel %vm602_vm7, %v1748_v38, -inf }
 0x48d   :  { %600 = vmax.xlane.f32.xlu1 %v599_v41  ;;  %593 = vmax.xlane.f32.xlu0 %v592_v42 }
 0x491   :  { %614 = vmax.xlane.f32.xlu1 %v613_v45  ;;  %607 = vmax.xlane.f32.xlu0 %v606_v47 }
 0x495   :  { %597 = vmax.xlane.f32.xlu1 %v596_v49  ;;  %590 = vmax.xlane.f32.xlu0 %v589_v50 }
 0x499   :  { %604 = vmax.xlane.f32.xlu0 %v603_v54 }
 0x49d   :  { %611 = vmax.xlane.f32.xlu0 %v610_v60 }
 0x4a6   :  { %1482 = vrot.lane.b32.xlu1 %v1481_v7, %s1524_s30 }
 0x4aa   :  { %1487 = vrot.lane.b32.xlu1 %v1486_v8, %s1524_s30 }
 0x4ae   :  { %1492 = vrot.lane.b32.xlu1 %v1491_v11, %s1524_s30 }
 0x4b3   :  { %1477 = vrot.lane.b32.xlu0 %v1476_v46, %s1524_s30 }
 0x51a   :  { %v594_v14 = vpop.xlane.xlu0 %593  ;;  %v601_v44 = vpop.xlane.xlu1 %600 }
 0x51b   :  { %v617_v15 = vsel %vm345_vm2, %v594_v14, %v601_v44 }
 0x51e   :  { %v608_v55 = vpop.xlane.xlu0 %607  ;;  %v615_v16 = vpop.xlane.xlu1 %614 }
 0x51f   :  { %v619_v17 = vsel %vm354_vm3, %v617_v15, %v608_v55 }
 0x520   :  { %v621_v57 = vsel %vm363_vm4, %v619_v17, %v615_v16 }
 0x521   :  { %v623_v20 = vsub.f32 %v1748_v38, %v621_v57 }
 0x522   :  { %v591_v18 = vpop.xlane.xlu0 %590  ;;  %v598_v19 = vpop.xlane.xlu1 %597 }
 0x523   :  { %v626_v26 = vmul.f32 1.442695, %v623_v20  ;;  %v616_v27 = vsel %vm345_vm2, %v591_v18, %v598_v19 }
 0x525   :  { %1500 = vpow2.f32 %v626_v26 }
 0x526   :  { %v605_v22 = vpop.xlane.xlu0 %604  ;;  %v1483_v25 = vpop.permute.xlu1 %1482 }
 0x527   :  { %v618_v28 = vsel %vm354_vm3, %v616_v27, %v605_v22  ;;  %v1485_v48 = vunpack.i.h.bf16 %v1483_v25  ;;  %v1484_v49 = vunpack.i.l.bf16 %v1483_v25 }
 0x529   :  { %v1418_v60 = vpack.c.bf16 %v1485_v48, %v1484_v49 }
 0x52a   :  { %v612_v29 = vpop.xlane.xlu0 %611  ;;  %v1488_v30 = vpop.permute.xlu1 %1487 }
 0x52b   :  { %v620_v33 = vsel %vm363_vm4, %v618_v28, %v612_v29  ;;  %v1490_v59 = vunpack.i.h.bf16 %v1488_v30  ;;  %v1489_v34 = vunpack.i.l.bf16 %v1488_v30 }
 0x52c   :  { %v622_v35 = vsub.f32 %v1754_v43, %v620_v33  ;;  %v25_v33 = vld [vmem:[%s1883_s1 + $0x48] sm:$0xff] }
 0x52d   :  { %v1421_v36 = vpack.c.bf16 %v1490_v59, %v1489_v34  ;;  %v26_v34 = vld [vmem:[%s1883_s1 + $0x50] sm:$0xff] }
 0x52e   :  { %v624_v37 = vmul.f32 1.442695, %v622_v35  ;;  %v1478_v39 = vpop.permute.xlu0 %1477  ;;  %v1493_v40 = vpop.permute.xlu1 %1492  ;;  %v27_v35 = vld [vmem:[%s1883_s1 + $0x58] sm:$0xff] }
 0x52f   :  { %v1480_v41 = vunpack.i.h.bf16 %v1478_v39  ;;  %v1479_v42 = vunpack.i.l.bf16 %v1478_v39  ;;  %v1495_v45 = vunpack.i.h.bf16 %v1493_v40  ;;  %v1494_v47 = vunpack.i.l.bf16 %v1493_v40  ;;  %1422 = vmatpush3.bf16.msra.mxu0 %v1421_v36  ;;  %v1501_v54 = vpop.eup %1500 }
 0x530   :  { %1502 = vpow2.f32 %v624_v37  ;;  %1423 = vmatprep.subr.bf16.mxu0 %v1520_v53 }
 0x531   :  { %v1415_v50 = vpack.c.bf16 %v1480_v41, %v1479_v42  ;;  %v1424_v51 = vpack.c.bf16 %v1495_v45, %v1494_v47  ;;  %v1000_v45 = vsub.s32 2, %v1568_v21  ;;  %v1006_v47 = vsub.s32 3, %v1568_v21 }
 0x533   :  { %1416 = vmatpush3.bf16.msra.mxu1 %v1415_v50  ;;  %1425 = vmatpush3.bf16.msra.mxu0 %v1424_v51  ;;  %v1001_v48 = vrot.slane %v1574_v23, %v1000_v45  ;;  %v1007_v51 = vrot.slane %v1574_v23, %v1006_v47  ;;  %v30_v23 = vld [vmem:[%s1883_s1 + $0x70] sm:$0xff] }
 0x534   :  { %1417 = vmatprep.subr.bf16.mxu1 %v1520_v53  ;;  %v20_v53 = vld [vmem:[%s1883_s1 + $0x20] sm:$0xff] }
 0x535   :  { %v1434_v63 = vpack.c.bf16 %v21_v62, %v20_v53  ;;  %v28_v62 = vld [vmem:[%s1883_s1 + $0x60] sm:$0xff] }
 0x536   :  { %1340 = vmatmul.mubr.msk.f32.vlgmr.msra.gmra.mrb[2].mxu0 %vm46_vm0, %v1501_v54 }
 0x537   :  { %1419 = vmatpush3.bf16.msra.mxu1 %v1418_v60  ;;  %1435 = vmatprep.subr.bf16.mxu0 %v1434_v63 }
 0x538   :  { %1427 = vmatprep.subr.bf16.mxu1 %v1426_v52  ;;  %1437 = vmatpush3.bf16.msra.mxu0 %v1434_v63  ;;  %v29_v63 = vld [vmem:[%s1883_s1 + $0x68] sm:$0xff] }
 0x539   :  { %1439 = vmatprep.subr.bf16.mxu0 %v1438_v2  ;;  %v1450_v0 = vpack.c.bf16 %v29_v63, %v28_v62 }
 0x53a   :  { %v1503_v61 = vpop.eup %1502 }
 0x53b   :  { %1329 = vmatmul.mubr.msk.f32.vlgmr.msra.gmra.mrb[4].mxu1 %vm46_vm0, %v1503_v61 }
 0x53c   :  { %1429 = vmatpush3.bf16.msra.mxu1 %v1426_v52  ;;  %1350 = vmatprep.mubr.msk.f32.mxu1 %vm46_vm0, %v1503_v61 }
 0x53d   :  { %1431 = vmatprep.subr.bf16.mxu1 %v1430_v56  ;;  %1441 = vmatpush3.bf16.msra.mxu0 %v1438_v2  ;;  %v32_v2 = vld [vmem:[%s1883_s1 + $0x80] sm:$0xff] }
 0x53e   :  { %1451 = vmatprep.subr.bf16.mxu0 %v1450_v0 }
 0x540   :  { %1433 = vmatpush3.bf16.msra.mxu1 %v1430_v56 }
 0x543   :  { %1351 = vmatmul.mubr.msk.f32.vlgmr.msra.gmra.mrb[6].mxu1 %vm46_vm0, %v1501_v54 }
 0x609   :  { %v802_v3 = vpop.f32.mrb[2].mxu0 }
 0x60a   :  { %v1341_v4 = vpop.f32.mrb[3].mxu0 }
 0x60b   :  { %v33_v4 = vld [vmem:[%s1883_s1 + $0x88] sm:$0xff] }
 0x60e   :  { %v713_v58 = vpop.f32.mrb[4].mxu1 }
 0x60f   :  { %v1330_v5 = vpop.f32.mrb[5].mxu1 }
 0x610   :  { %v34_v5 = vld [vmem:[%s1883_s1 + $0x90] sm:$0xff] }
 0x616   :  { %v1352_v6 = vpop.f32.mrb[6].mxu1 }
 0x617   :  { %1504 = vrcp.f32 %v1352_v6  ;;  %v872_v7 = vpop.f32.mrb[7].mxu1  ;;  %v35_v6 = vld [vmem:[%s1883_s1 + $0x98] sm:$0xff] }
 0x618   :  { %1506 = vrcp.f32 %v872_v7  ;;  %v1462_v7 = vpack.c.bf16 %v35_v6, %v34_v5 }
 0x621   :  { %v1505_v8 = vpop.eup %1504 }
 0x622   :  { %v1507_v9 = vpop.eup %1506  ;;  %v884_v10 = vmul.f32 %v1505_v8, %v802_v3  ;;  %v1454_v3 = vpack.c.bf16 %v31_v1, %v30_v23  ;;  %v1013_v8 = vrot.slane %v1744_v24, %v1579_v31 }
 0x623   :  { %v883_v11 = vmul.f32 %v1507_v9, %v713_v58  ;;  %v1458_v58 = vpack.c.bf16 %v33_v4, %v32_v2 }
 0x625   :  { %1361 = vmatprep.mubr.msk.f32.mxu0 %vm46_vm0, %v883_v11 }
 0x626   :  { %1362 = vmatmul.mubr.msk.f32.vlgmr.msra.gmra.mrb[4].mxu0 %vm46_vm0, %v884_v10 }
 0x627   :  { %1453 = vmatpush3.bf16.msra.mxu0 %v1450_v0 }
 0x628   :  { %1455 = vmatprep.subr.bf16.mxu0 %v1454_v3 }
 0x62b   :  { %1457 = vmatpush3.bf16.msra.mxu0 %v1454_v3 }
 0x62c   :  { %1459 = vmatprep.subr.bf16.mxu0 %v1458_v58 }
 0x62f   :  { %1461 = vmatpush3.bf16.msra.mxu0 %v1458_v58 }
 0x630   :  { %1463 = vmatprep.subr.bf16.mxu0 %v1462_v7 }
 0x633   :  { %1465 = vmatpush3.bf16.msra.mxu0 %v1462_v7 }
 0x6f9   :  { %v1363_v46 = vpop.f32.mrb[4].mxu0 }
 0x6fa   :  { %v967_v14 = vadd.f32 %v1363_v46, %v888_v13  ;;  %v961_v44 = vpop.f32.mrb[5].mxu0 }
 0x6fb   :  { %v962_v15 = vadd.f32 %v961_v44, %v888_v13 }
 0x6fc   :  { %v1805_v55 = vadd.f32 %v967_v14, %v967_v14 }
 0x6fd   :  { %v1807_v16 = vadd.f32 %v962_v15, %v962_v15 }
 0x6fe   :  { %v975_v17 = vsel %vm46_vm0, %v1805_v55, 0.0 }
 0x6ff   :  { %976 = vadd.xlane.f32.xlu1 %v975_v17  ;;  %v972_v57 = vsel %vm46_vm0, %v1807_v16, 0.0 }
 0x700   :  { %973 = vadd.xlane.f32.xlu0 %v972_v57 }
 0x710   :  { %1207 = vrot.lane.b32.xlu1 %v1748_v38, %s1516_s25  ;;  %v24_v38 = vld [vmem:[%s1883_s1 + $0x40] sm:$0xff] }
 0x711   :  { %v1442_v59 = vpack.c.bf16 %v25_v33, %v24_v38  ;;  %v1200_v38 = vrot.slane %v1744_v24, %v82_v32 }
 0x713   :  { %1443 = vmatprep.subr.bf16.mxu1 %v1442_v59 }
 0x714   :  { %1445 = vmatpush3.bf16.msra.mxu1 %v1442_v59 }
 0x78c   :  { %v977_v18 = vpop.xlane.xlu1 %976 }
 0x78d   :  { %v979_v19 = vmul.f32 0.03125, %v977_v18  ;;  %v974_v20 = vpop.xlane.xlu0 %973 }
 0x78e   :  { %v978_v22 = vmul.f32 0.03125, %v974_v20 }
 0x78f   :  { %v981_v25 = vsub.f32 %v1805_v55, %v979_v19 }
 0x790   :  { %v980_v26 = vsub.f32 %v1807_v16, %v978_v22 }
 0x791   :  { %v983_v29 = vmul.f32 %v981_v25, %v981_v25 }
 0x792   :  { %v982_v27 = vmul.f32 %v980_v26, %v980_v26 }
 0x793   :  { %v987_v30 = vsel %vm46_vm0, %v983_v29, 0.0 }
 0x794   :  { %v984_v28 = vsel %vm46_vm0, %v982_v27, 0.0 }
 0x795   :  { %985 = vadd.xlane.f32.xlu0 %v984_v28 }
 0x799   :  { %988 = vadd.xlane.f32.xlu0 %v987_v30 }
 0x7af   :  { %1205 = vrot.lane.b32.xlu0 %v1754_v43, %s1516_s25  ;;  %v1446_v43 = vpack.c.bf16 %v27_v35, %v26_v34 }
 0x7b1   :  { %1447 = vmatprep.subr.bf16.mxu1 %v1446_v43 }
 0x7b2   :  { %1449 = vmatpush3.bf16.msra.mxu1 %v1446_v43 }
 0x822   :  { %v986_v36 = vpop.xlane.xlu0 %985 }
 0x823   :  { %v990_v37 = vmul.f32 0.03125, %v986_v36  ;;  %v1208_v36 = vpop.permute.xlu1 %1207 }
 0x825   :  { %v992_v39 = vadd.f32 1e-12, %v990_v37 }
 0x826   :  { %v989_v40 = vpop.xlane.xlu0 %988 }
 0x827   :  { %1508 = vrsqrt.f32 %v992_v39  ;;  %v991_v41 = vmul.f32 0.03125, %v989_v40 }
 0x829   :  { %v993_v42 = vadd.f32 1e-12, %v991_v41 }
 0x82a   :  { %v1206_v39 = vpop.permute.xlu0 %1205 }
 0x82b   :  { %1510 = vrsqrt.f32 %v993_v42 }
 0x831   :  { %v1509_v49 = vpop.eup %1508 }
 0x832   :  { %v996_v50 = vmul.f32 %v1509_v49, %v980_v26 }
 0x834   :  { %v1002_v52 = vmul.f32 %v1001_v48, %v996_v50 }
 0x835   :  { %v1511_v54 = vpop.eup %1510 }
 0x836   :  { %v997_v60 = vmul.f32 %v1511_v54, %v981_v25  ;;  %v1008_v56 = vadd.f32 %v1007_v51, %v1002_v52 }
 0x838   :  { %v1003_v61 = vmul.f32 %v1001_v48, %v997_v60  ;;  %1372 = vmatprep.mubr.msk.f32.mxu1 %vm46_vm0, %v1008_v56 }
 0x83a   :  { %v1009_v53 = vadd.f32 %v1007_v51, %v1003_v61 }
 0x83c   :  { %1373 = vmatmul.mubr.msk.f32.vlgmr.msra.gmra.mrb[8].mxu1 %vm46_vm0, %v1009_v53 }
 0x90f   :  { %v1374_v9 = vpop.f32.mrb[8].mxu1 }
 0x910   :  { %v1092_v10 = vadd.f32 %v1374_v9, %v1013_v8  ;;  %v1086_v11 = vpop.f32.mrb[9].mxu1 }
 0x911   :  { %v1087_v12 = vadd.f32 %v1086_v11, %v1013_v8 }
 0x912   :  { %v1098_v13 = vmul.f32 0.044715, %v1092_v10  ;;  %v1096_v28 = vmul.f32 0.5, %v1092_v10 }
 0x913   :  { %v1097_v46 = vmul.f32 0.044715, %v1087_v12  ;;  %v1095_v31 = vmul.f32 0.5, %v1087_v12 }
 0x914   :  { %v1100_v14 = vmul.f32 %v1098_v13, %v1092_v10 }
 0x915   :  { %v1099_v44 = vmul.f32 %v1097_v46, %v1087_v12 }
 0x916   :  { %v1102_v15 = vmul.f32 %v1100_v14, %v1092_v10 }
 0x917   :  { %v1101_v17 = vmul.f32 %v1099_v44, %v1087_v12 }
 0x918   :  { %v1104_v57 = vadd.f32 %v1102_v15, %v1092_v10 }
 0x919   :  { %v1103_v18 = vadd.f32 %v1101_v17, %v1087_v12 }
 0x91a   :  { %v1106_v19 = vmul.f32 0.7978846, %v1104_v57 }
 0x91b   :  { %v1105_v20 = vmul.f32 0.7978846, %v1103_v18 }
 0x91c   :  { %1512 = vtanh.f32 %v1106_v19 }
 0x91d   :  { %1514 = vtanh.f32 %v1105_v20 }
 0x926   :  { %v1513_v22 = vpop.eup %1512 }
 0x927   :  { %v1515_v25 = vpop.eup %1514  ;;  %v1110_v26 = vadd.f32 1.0, %v1513_v22 }
 0x928   :  { %v1109_v27 = vadd.f32 1.0, %v1515_v25 }
 0x929   :  { %v1112_v30 = vmul.f32 %v1110_v26, %v1096_v28 }
 0x92a   :  { %v1111_v29 = vmul.f32 %v1109_v27, %v1095_v31 }
 0x92c   :  { %1391 = vmatprep.mubr.msk.f32.mxu0 %vm1113_vm8, %v1111_v29 }
 0x92d   :  { %1392 = vmatmul.mubr.msk.f32.vlgmr.msra.gmra.mrb[6].mxu0 %vm1113_vm8, %v1112_v30 }
 0xa00   :  { %v1393_v33 = vpop.f32.mrb[6].mxu0 }
 0xa01   :  { %v1196_v59 = vadd.f32 %v1393_v33, %v1805_v55  ;;  %v1186_v34 = vpop.f32.mrb[7].mxu0 }
 0xa02   :  { %v1195_v35 = vadd.f32 %v1186_v34, %v1807_v16 }
 0xa03   :  { %v1202_v43 = vadd.f32 %v1200_v38, %v1196_v59 }
 0xa04   :  { %v1201_v37 = vadd.f32 %v1200_v38, %v1195_v35 }
 0xa05   :  { %v1212_v40 = vsel %vm46_vm0, %v1202_v43, %v1208_v36 }
 0xa06   :  { %1214 = vst.msk [vmem:[%s1885_s3 + $0x8] sm:$0xff] %vm1113_vm8, %v1212_v40  ;;  %v1211_v21 = vsel %vm46_vm0, %v1201_v37, %v1206_v39 }
 0xa07   :  { %1213 = vst.msk [vmem:[%s1885_s3] sm:$0xff] %vm1113_vm8, %v1211_v21 }

</bundles_post_ra>
